<compile_context>
chip_gen: v5e
topology: v5e:2x2
jax: 0.10.0
libtpu: 0.0.40
codegen_flags: <defaults>
</compile_context>

<pallas_src>
import jax
import jax.numpy as jnp
from jax.experimental import pallas as pl
from jax.experimental.pallas import tpu as pltpu


_ROW_ALIGN = 32          # sublane-safe multiple for f32 (8), bf16 (16), int8/fp8 (32)
_LANES = 128


def _make_kernel(compute_dtype):
    def _adaptive_act_kernel(a_ref, x_ref, o_ref):
        # a_ref: (1,) f32 scalar in SMEM; x_ref/o_ref: (block_rows, cols) VMEM tiles in
        # the array's native dtype. Compute in `compute_dtype` on vregs.
        a = a_ref[0].astype(compute_dtype)
        x = x_ref[...].astype(compute_dtype)
        o_ref[...] = jnp.tanh(a * x).astype(o_ref.dtype)
    return _adaptive_act_kernel


def _chip_profile():
    """Coarse generation dispatch from device_kind (safe fallback if unavailable)."""
    try:
        kind = jax.devices()[0].device_kind.lower()
    except Exception:
        kind = ""
    if "v7" in kind or "tpu7" in kind or "7x" in kind:
        # 2 TC/chip, 64 MiB VMEM/TC, 3.2 TB/s HBM -> bigger blocks, balanced megacore split.
        return dict(name="v7x", multi_tc=True, native_bf16=True, block_bytes=8 << 20)
    if "v6" in kind:
        return dict(name="v6e", multi_tc=False, native_bf16=True, block_bytes=2 << 20)
    if "v5" in kind and ("lite" in kind or "5e" in kind):
        return dict(name="v5e", multi_tc=False, native_bf16=False, block_bytes=2 << 20)
    # Unknown / other parts: conservative defaults.
    return dict(name="generic", multi_tc=False, native_bf16=False, block_bytes=2 << 20)


def _choose_cols(total):
    """Largest lane-dense width that divides the element count (free reshape)."""
    for cand in (4096, 2048, 1024, 512, 256, 128):
        if total % cand == 0:
            return cand
    return None


def adaptive_activation(x, a, *, target_block_bytes=None, donate_x=False):
    """tanh(a * x) elementwise via a Pallas TPU streaming kernel.

    x: arbitrary-shaped float array (e.g. NCHW feature map), any float dtype.
    a: scalar learnable parameter.
    donate_x: alias the input buffer for the output (caller must donate x).
    """
    orig_shape = x.shape
    dtype = x.dtype
    total = x.size

    prof = _chip_profile()
    a_f32 = jnp.asarray(a, dtype=jnp.float32)

    if total == 0:
        return x

    cols = _choose_cols(total)
    if cols is None:
        # Ragged element count: run the kernel on the 128-aligned prefix and do the
        # (<128-element) tail in plain JAX. Avoids pad+slice round trips of the whole
        # tensor (~3x HBM traffic) the old path incurred.
        flat = x.reshape(-1)
        aligned = (total // _LANES) * _LANES
        tail = jnp.tanh(a_f32 * flat[aligned:].astype(jnp.float32)).astype(dtype)
        if aligned == 0:
            return tail.reshape(orig_shape)
        head = adaptive_activation(flat[:aligned], a,
                                   target_block_bytes=target_block_bytes,
                                   donate_x=False)
        return jnp.concatenate([head, tail]).reshape(orig_shape)

    rows = total // cols
    x2d = x.reshape(rows, cols)          # contiguous reshape: metadata-only, no copy

    itemsize = jnp.dtype(dtype).itemsize
    block_bytes = target_block_bytes if target_block_bytes is not None else prof["block_bytes"]
    if prof["name"] == "v5e":
        # Keep 4 x block_bytes (in+out, double-buffered) under v5e's 16 MiB scoped default.
        block_bytes = min(block_bytes, 3 << 20)

    target_rows = max(_ROW_ALIGN, block_bytes // (cols * itemsize))
    rows_rounded = pl.cdiv(rows, _ROW_ALIGN) * _ROW_ALIGN
    block_rows = max(_ROW_ALIGN, min(target_rows, rows_rounded) // _ROW_ALIGN * _ROW_ALIGN)
    num_blocks = pl.cdiv(rows, block_rows)

    # Megacore (v7x only): even, balanced block count with >=2 blocks per core when the
    # array is big enough. On single-TC parts (v5e/v6e) keep the fewest, largest blocks.
    if prof["multi_tc"] and rows_rounded >= 4 * _ROW_ALIGN:
        if num_blocks < 4:
            tgt = 4
        elif num_blocks % 2:
            tgt = num_blocks + 1
        else:
            tgt = num_blocks
        block_rows = max(_ROW_ALIGN, pl.cdiv(pl.cdiv(rows, tgt), _ROW_ALIGN) * _ROW_ALIGN)
        num_blocks = pl.cdiv(rows, block_rows)

    # Raise the scoped-VMEM limit only when the double-buffered footprint needs it
    # (large v7x blocks); leave the default otherwise.
    actual_block_bytes = block_rows * cols * itemsize
    vmem_limit = None
    if 4 * actual_block_bytes > (24 << 20):
        vmem_limit = min(4 * actual_block_bytes + (16 << 20), 56 << 20)

    # Native bf16 compute on bf16-capable VPU/EUP (v6e/v7x); f32 compute otherwise
    # (v5e EUP is f32-only) and for f32 inputs.
    if dtype == jnp.bfloat16 and prof["native_bf16"]:
        compute_dtype = jnp.bfloat16
    else:
        compute_dtype = jnp.float32

    a_arr = a_f32.reshape(1)

    out2d = pl.pallas_call(
        _make_kernel(compute_dtype),
        out_shape=jax.ShapeDtypeStruct((rows, cols), dtype),
        grid_spec=pltpu.PrefetchScalarGridSpec(
            num_scalar_prefetch=0,
            grid=(num_blocks,),
            in_specs=[
                pl.BlockSpec(memory_space=pltpu.SMEM),                    # scalar a
                pl.BlockSpec((block_rows, cols), lambda i: (i, 0)),       # x tile
            ],
            out_specs=pl.BlockSpec((block_rows, cols), lambda i: (i, 0)),
        ),
        compiler_params=pltpu.CompilerParams(
            dimension_semantics=("parallel",),
            vmem_limit_bytes=vmem_limit,
        ),
        input_output_aliases=({1: 0} if donate_x else {}),
    )(a_arr, x2d)

    return out2d.reshape(orig_shape)


if __name__ == "__main__":
    key = jax.random.PRNGKey(0)
    # Learnable parameter initialized like the PyTorch module (a = 1.0).
    a_param = jnp.float32(1.0)

    # Small NCHW-like input consistent with a PINN feature map.
    x = jax.random.normal(key, (2, 4, 16, 16), dtype=jnp.float32)
    y = jax.block_until_ready(adaptive_activation(x, a_param))
    y_ref = jnp.tanh(a_param * x)
    assert y.shape == x.shape and y.dtype == x.dtype
    assert jnp.allclose(y, y_ref, atol=1e-6, rtol=1e-6)

    # bf16 case exercises the native-dtype streaming / bf16-compute path (v6e/v7x).
    xb = jax.random.normal(jax.random.PRNGKey(1), (2, 8, 32, 32), dtype=jnp.bfloat16)
    yb = jax.block_until_ready(adaptive_activation(xb, jnp.float32(0.7)))
    yb_ref = jnp.tanh(jnp.float32(0.7) * xb.astype(jnp.float32)).astype(jnp.bfloat16)
    assert yb.shape == xb.shape and yb.dtype == xb.dtype
    assert jnp.allclose(yb.astype(jnp.float32), yb_ref.astype(jnp.float32), atol=2e-2, rtol=2e-2)

    # Ragged element count (273 = 2*128 + 17) exercises the aligned-prefix + JAX-tail path.
    xr = jax.random.normal(jax.random.PRNGKey(2), (3, 7, 13), dtype=jnp.float32)
    yr = jax.block_until_ready(adaptive_activation(xr, jnp.float32(1.3)))
    yr_ref = jnp.tanh(jnp.float32(1.3) * xr)
    assert yr.shape == xr.shape and yr.dtype == xr.dtype
    assert jnp.allclose(yr, yr_ref, atol=1e-6, rtol=1e-6)

    print("KERNEL_OK")
</pallas_src>

<mosaic_0001>
module attributes {stable_mosaic.version = 11 : i64} {
  func.func @_adaptive_act_kernel(%arg0: i32, %arg1: memref<1xf32, #tpu.memory_space<smem>>, %arg2: memref<32x2048xf32, #tpu.memory_space<vmem>>, %arg3: memref<32x2048xf32, #tpu.memory_space<vmem>>) attributes {dimension_semantics = [#tpu.dimension_semantics<parallel>], iteration_bounds = array<i64: 1>, scalar_prefetch = 0 : i64, scratch_operands = 0 : i64, tpu.core_type = #tpu.core_type<tc>, window_params = [{transform_indices = @transform_0, window_bounds = array<i64: 1>}, {transform_indices = @transform_1, window_bounds = array<i64: 32, 2048>}, {transform_indices = @transform_2, window_bounds = array<i64: 32, 2048>}]} {
    %c0 = arith.constant 0 : index
    %0 = memref.load %arg1[%c0] : memref<1xf32, #tpu.memory_space<smem>>
    %c0_0 = arith.constant 0 : index
    %c0_1 = arith.constant 0 : index
    %1 = vector.load %arg2[%c0_0, %c0_1] : memref<32x2048xf32, #tpu.memory_space<vmem>>, vector<32x2048xf32>
    %2 = vector.broadcast %0 : f32 to vector<32x2048xf32>
    %3 = arith.mulf %2, %1 : vector<32x2048xf32>
    %4 = math.tanh %3 : vector<32x2048xf32>
    %c0_2 = arith.constant 0 : index
    %c0_3 = arith.constant 0 : index
    %5 = vector.load %arg3[%c0_2, %c0_3] : memref<32x2048xf32, #tpu.memory_space<vmem>>, vector<32x2048xf32>
    tpu.vector_store %arg3[%c0_2, %c0_3], %4 {strides = array<i32>} : memref<32x2048xf32, #tpu.memory_space<vmem>>, vector<32x2048xf32>,
    return
  }
  func.func @transform_0(%arg0: i32) -> i32 {
    %c0_i32 = arith.constant 0 : i32
    %c0_i32_0 = arith.constant 0 : i32
    return %c0_i32 : i32
  }
  func.func @transform_1(%arg0: i32) -> (i32, i32) {
    %c0_i32 = arith.constant 0 : i32
    %c0_i32_0 = arith.constant 0 : i32
    return %arg0, %c0_i32 : i32, i32
  }
  func.func @transform_2(%arg0: i32) -> (i32, i32) {
    %c0_i32 = arith.constant 0 : i32
    %c0_i32_0 = arith.constant 0 : i32
    return %arg0, %c0_i32 : i32, i32
  }
}

</mosaic_0001>

<bundles_post_ra>
// kernel: tpu_custom_call.1
= control target key start
LH: loop header
LB: loop body
LE: loop exit
PB: predicated region body
PF: predicated region fallthrough
CT: control target
= control target key end

     0   :  { %8 = vsyncpa [#allocation4], 0  ;;  %s590_s0 = inlined_call_operand.<no memory space> [shape: f32[1], index: 0, kind: input, shape index: {}]   ;;  %s591_s1 = inlined_call_operand.hbm [shape: f32[1,2048], index: 1, kind: input, shape index: {}]   ;;  %s592_s2 = inlined_call_operand.hbm [shape: f32[1,2048], index: 2, kind: output, shape index: {}]  }
   0x1   :  { %9 = vsyncpa [#allocation5], 0 }
   0x2   :  { %15 = vsyncadd [#allocation4], 7936  ;;  %s16_s11 = sshll.u32 %s591_s1, 4  ;;  %s490_s12 = smov [#allocation3]   ;;  %s17_s11 = int_to_ptr.hbm [resolvable:$true] %s16_s11 }
   0x3   :  { %s18_s13 = sshll.u32 %s490_s12, 4  ;;  %s491_s14 = smov 256   ;;  %s19_s13 = int_to_ptr.vmem [resolvable:$true] %s18_s13 }
   0x4   :  { %s492_s15 = smov 16  }
   0x5   :  { %24 = dma.hbm_to_vmem [thread:$0]  %s17_s11, 256, %s19_s13, [#allocation4], %s491_s14, %s491_s14, %s492_s15  }
   0x6   :  { %486 = dma.done.wait [#allocation4], 8192  }
   0x7   :  { %487 = vsyncadd [#allocation4], 4294959104  ;;  %v518_v0 = vstv %s590_s0  ;;  %v30_v1 = vld [vmem:[#allocation3] sm:$0xff]  ;;  %v31_v2 = vld [vmem:[#allocation3 + $0x8] sm:$0xff] }
   0x8   :  { %v32_v3 = vld [vmem:[#allocation3 + $0x10] sm:$0xff]  ;;  %v95_v4 = vmul.f32 %v518_v0, %v30_v1  ;;  %v96_v5 = vmul.f32 %v518_v0, %v31_v2  ;;  %v33_v7 = vld [vmem:[#allocation3 + $0x18] sm:$0xff]  ;;  %v34_v8 = vld [vmem:[#allocation3 + $0x20] sm:$0xff] }
   0x9   :  { %v97_v6 = vmul.f32 %v518_v0, %v32_v3  ;;  %v35_v9 = vld [vmem:[#allocation3 + $0x28] sm:$0xff]  ;;  %v98_v10 = vmul.f32 %v518_v0, %v33_v7  ;;  %v36_v11 = vld [vmem:[#allocation3 + $0x30] sm:$0xff]  ;;  %v99_v12 = vmul.f32 %v518_v0, %v34_v8  ;;  %v37_v13 = vld [vmem:[#allocation3 + $0x38] sm:$0xff] }
   0xa   :  { %310 = vtanh.f32 %v95_v4  ;;  %v100_v14 = vmul.f32 %v518_v0, %v35_v9  ;;  %v38_v15 = vld [vmem:[#allocation3 + $0x40] sm:$0xff]  ;;  %v101_v16 = vmul.f32 %v518_v0, %v36_v11  ;;  %v39_v17 = vld [vmem:[#allocation3 + $0x48] sm:$0xff]  ;;  %v102_v18 = vmul.f32 %v518_v0, %v37_v13  ;;  %v40_v19 = vld [vmem:[#allocation3 + $0x50] sm:$0xff] }
   0xb   :  { %312 = vtanh.f32 %v96_v5  ;;  %v103_v20 = vmul.f32 %v518_v0, %v38_v15  ;;  %v41_v21 = vld [vmem:[#allocation3 + $0x58] sm:$0xff]  ;;  %v104_v22 = vmul.f32 %v518_v0, %v39_v17  ;;  %v42_v23 = vld [vmem:[#allocation3 + $0x60] sm:$0xff]  ;;  %v105_v25 = vmul.f32 %v518_v0, %v40_v19  ;;  %v43_v26 = vld [vmem:[#allocation3 + $0x68] sm:$0xff] }
   0xc   :  { %314 = vtanh.f32 %v97_v6  ;;  %v106_v28 = vmul.f32 %v518_v0, %v41_v21  ;;  %v44_v29 = vld [vmem:[#allocation3 + $0x70] sm:$0xff]  ;;  %v107_v31 = vmul.f32 %v518_v0, %v42_v23  ;;  %v45_v32 = vld [vmem:[#allocation3 + $0x78] sm:$0xff]  ;;  %v108_v34 = vmul.f32 %v518_v0, %v43_v26  ;;  %v46_v35 = vld [vmem:[#allocation3 + $0x80] sm:$0xff] }
   0xd   :  { %316 = vtanh.f32 %v98_v10  ;;  %v109_v37 = vmul.f32 %v518_v0, %v44_v29  ;;  %v47_v38 = vld [vmem:[#allocation3 + $0x88] sm:$0xff]  ;;  %v110_v40 = vmul.f32 %v518_v0, %v45_v32  ;;  %v48_v41 = vld [vmem:[#allocation3 + $0x90] sm:$0xff]  ;;  %v111_v43 = vmul.f32 %v518_v0, %v46_v35  ;;  %v49_v44 = vld [vmem:[#allocation3 + $0x98] sm:$0xff] }
   0xe   :  { %318 = vtanh.f32 %v99_v12  ;;  %v112_v46 = vmul.f32 %v518_v0, %v47_v38  ;;  %v50_v47 = vld [vmem:[#allocation3 + $0xa0] sm:$0xff]  ;;  %v113_v49 = vmul.f32 %v518_v0, %v48_v41  ;;  %v51_v50 = vld [vmem:[#allocation3 + $0xa8] sm:$0xff]  ;;  %v114_v52 = vmul.f32 %v518_v0, %v49_v44  ;;  %v52_v53 = vld [vmem:[#allocation3 + $0xb0] sm:$0xff] }
   0xf   :  { %320 = vtanh.f32 %v100_v14  ;;  %v115_v55 = vmul.f32 %v518_v0, %v50_v47  ;;  %v53_v56 = vld [vmem:[#allocation3 + $0xb8] sm:$0xff]  ;;  %v116_v58 = vmul.f32 %v518_v0, %v51_v50  ;;  %v54_v59 = vld [vmem:[#allocation3 + $0xc0] sm:$0xff]  ;;  %v117_v61 = vmul.f32 %v518_v0, %v52_v53  ;;  %v55_v62 = vld [vmem:[#allocation3 + $0xc8] sm:$0xff] }
  0x10   :  { %v311_v24 = vpop.eup %310  ;;  %322 = vtanh.f32 %v101_v16  ;;  %v118_v1 = vmul.f32 %v518_v0, %v53_v56  ;;  %v56_v2 = vld [vmem:[#allocation3 + $0xd0] sm:$0xff]  ;;  %v119_v4 = vmul.f32 %v518_v0, %v54_v59  ;;  %v57_v5 = vld [vmem:[#allocation3 + $0xd8] sm:$0xff]  ;;  %v120_v7 = vmul.f32 %v518_v0, %v55_v62  ;;  %v58_v8 = vld [vmem:[#allocation3 + $0xe0] sm:$0xff] }
  0x11   :  { %v313_v27 = vpop.eup %312  ;;  %223 = vst [vmem:[#allocation6] sm:$0xff] %v311_v24  ;;  %324 = vtanh.f32 %v102_v18  ;;  %v121_v10 = vmul.f32 %v518_v0, %v56_v2  ;;  %v59_v11 = vld [vmem:[#allocation3 + $0xe8] sm:$0xff]  ;;  %v122_v13 = vmul.f32 %v518_v0, %v57_v5  ;;  %v60_v14 = vld [vmem:[#allocation3 + $0xf0] sm:$0xff]  ;;  %v123_v16 = vmul.f32 %v518_v0, %v58_v8  ;;  %v61_v17 = vld [vmem:[#allocation3 + $0xf8] sm:$0xff] }
  0x12   :  { %v315_v30 = vpop.eup %314  ;;  %224 = vst [vmem:[#allocation6 + $0x8] sm:$0xff] %v313_v27  ;;  %326 = vtanh.f32 %v103_v20  ;;  %v124_v19 = vmul.f32 %v518_v0, %v59_v11  ;;  %v62_v20 = vld [vmem:[#allocation3 + $0x100] sm:$0xff]  ;;  %v63_v23 = vld [vmem:[#allocation3 + $0x108] sm:$0xff]  ;;  %v64_v26 = vld [vmem:[#allocation3 + $0x110] sm:$0xff] }
  0x13   :  { %v317_v33 = vpop.eup %316  ;;  %225 = vst [vmem:[#allocation6 + $0x10] sm:$0xff] %v315_v30  ;;  %328 = vtanh.f32 %v104_v22  ;;  %v125_v22 = vmul.f32 %v518_v0, %v60_v14  ;;  %v65_v29 = vld [vmem:[#allocation3 + $0x118] sm:$0xff]  ;;  %v66_v32 = vld [vmem:[#allocation3 + $0x120] sm:$0xff]  ;;  %v67_v35 = vld [vmem:[#allocation3 + $0x128] sm:$0xff] }
  0x14   :  { %v319_v36 = vpop.eup %318  ;;  %226 = vst [vmem:[#allocation6 + $0x18] sm:$0xff] %v317_v33  ;;  %330 = vtanh.f32 %v105_v25  ;;  %v126_v25 = vmul.f32 %v518_v0, %v61_v17  ;;  %v68_v38 = vld [vmem:[#allocation3 + $0x130] sm:$0xff]  ;;  %v69_v41 = vld [vmem:[#allocation3 + $0x138] sm:$0xff]  ;;  %v70_v44 = vld [vmem:[#allocation3 + $0x140] sm:$0xff] }
  0x15   :  { %v321_v39 = vpop.eup %320  ;;  %227 = vst [vmem:[#allocation6 + $0x20] sm:$0xff] %v319_v36  ;;  %332 = vtanh.f32 %v106_v28  ;;  %v127_v28 = vmul.f32 %v518_v0, %v62_v20  ;;  %v71_v47 = vld [vmem:[#allocation3 + $0x148] sm:$0xff]  ;;  %v72_v50 = vld [vmem:[#allocation3 + $0x150] sm:$0xff]  ;;  %v73_v53 = vld [vmem:[#allocation3 + $0x158] sm:$0xff] }
  0x16   :  { %v323_v42 = vpop.eup %322  ;;  %228 = vst [vmem:[#allocation6 + $0x28] sm:$0xff] %v321_v39  ;;  %334 = vtanh.f32 %v107_v31  ;;  %v128_v31 = vmul.f32 %v518_v0, %v63_v23  ;;  %v74_v56 = vld [vmem:[#allocation3 + $0x160] sm:$0xff]  ;;  %v75_v59 = vld [vmem:[#allocation3 + $0x168] sm:$0xff]  ;;  %v76_v62 = vld [vmem:[#allocation3 + $0x170] sm:$0xff] }
  0x17   :  { %v325_v45 = vpop.eup %324  ;;  %229 = vst [vmem:[#allocation6 + $0x30] sm:$0xff] %v323_v42  ;;  %336 = vtanh.f32 %v108_v34  ;;  %v129_v34 = vmul.f32 %v518_v0, %v64_v26  ;;  %v77_v2 = vld [vmem:[#allocation3 + $0x178] sm:$0xff]  ;;  %v78_v5 = vld [vmem:[#allocation3 + $0x180] sm:$0xff]  ;;  %v79_v8 = vld [vmem:[#allocation3 + $0x188] sm:$0xff] }
  0x18   :  { %v327_v48 = vpop.eup %326  ;;  %230 = vst [vmem:[#allocation6 + $0x38] sm:$0xff] %v325_v45  ;;  %338 = vtanh.f32 %v109_v37  ;;  %v130_v37 = vmul.f32 %v518_v0, %v65_v29  ;;  %v80_v11 = vld [vmem:[#allocation3 + $0x190] sm:$0xff]  ;;  %v81_v14 = vld [vmem:[#allocation3 + $0x198] sm:$0xff]  ;;  %v82_v17 = vld [vmem:[#allocation3 + $0x1a0] sm:$0xff] }
  0x19   :  { %v329_v51 = vpop.eup %328  ;;  %231 = vst [vmem:[#allocation6 + $0x40] sm:$0xff] %v327_v48  ;;  %340 = vtanh.f32 %v110_v40  ;;  %v131_v40 = vmul.f32 %v518_v0, %v66_v32  ;;  %v83_v20 = vld [vmem:[#allocation3 + $0x1a8] sm:$0xff]  ;;  %v84_v23 = vld [vmem:[#allocation3 + $0x1b0] sm:$0xff]  ;;  %v85_v26 = vld [vmem:[#allocation3 + $0x1b8] sm:$0xff] }
  0x1a   :  { %v331_v54 = vpop.eup %330  ;;  %232 = vst [vmem:[#allocation6 + $0x48] sm:$0xff] %v329_v51  ;;  %342 = vtanh.f32 %v111_v43  ;;  %v132_v43 = vmul.f32 %v518_v0, %v67_v35  ;;  %v86_v29 = vld [vmem:[#allocation3 + $0x1c0] sm:$0xff]  ;;  %v87_v32 = vld [vmem:[#allocation3 + $0x1c8] sm:$0xff]  ;;  %v88_v35 = vld [vmem:[#allocation3 + $0x1d0] sm:$0xff] }
  0x1b   :  { %v333_v57 = vpop.eup %332  ;;  %233 = vst [vmem:[#allocation6 + $0x50] sm:$0xff] %v331_v54  ;;  %344 = vtanh.f32 %v112_v46  ;;  %v133_v46 = vmul.f32 %v518_v0, %v68_v38  ;;  %v89_v38 = vld [vmem:[#allocation3 + $0x1d8] sm:$0xff] }
  0x1c   :  { %v335_v60 = vpop.eup %334  ;;  %234 = vst [vmem:[#allocation6 + $0x58] sm:$0xff] %v333_v57  ;;  %346 = vtanh.f32 %v113_v49  ;;  %v134_v49 = vmul.f32 %v518_v0, %v69_v41  ;;  %v90_v41 = vld [vmem:[#allocation3 + $0x1e0] sm:$0xff] }
  0x1d   :  { %v337_v63 = vpop.eup %336  ;;  %235 = vst [vmem:[#allocation6 + $0x60] sm:$0xff] %v335_v60  ;;  %348 = vtanh.f32 %v114_v52  ;;  %v135_v52 = vmul.f32 %v518_v0, %v70_v44  ;;  %v91_v44 = vld [vmem:[#allocation3 + $0x1e8] sm:$0xff] }
  0x1e   :  { %v339_v3 = vpop.eup %338  ;;  %236 = vst [vmem:[#allocation6 + $0x68] sm:$0xff] %v337_v63  ;;  %350 = vtanh.f32 %v115_v55  ;;  %v136_v55 = vmul.f32 %v518_v0, %v71_v47  ;;  %v92_v47 = vld [vmem:[#allocation3 + $0x1f0] sm:$0xff] }
  0x1f   :  { %v341_v6 = vpop.eup %340  ;;  %237 = vst [vmem:[#allocation6 + $0x70] sm:$0xff] %v339_v3  ;;  %352 = vtanh.f32 %v116_v58  ;;  %v137_v58 = vmul.f32 %v518_v0, %v72_v50  ;;  %v93_v50 = vld [vmem:[#allocation3 + $0x1f8] sm:$0xff] }
  0x20   :  { %v343_v9 = vpop.eup %342  ;;  %238 = vst [vmem:[#allocation6 + $0x78] sm:$0xff] %v341_v6  ;;  %354 = vtanh.f32 %v117_v61  ;;  %v138_v61 = vmul.f32 %v518_v0, %v73_v53 }
  0x21   :  { %v345_v12 = vpop.eup %344  ;;  %239 = vst [vmem:[#allocation6 + $0x80] sm:$0xff] %v343_v9  ;;  %356 = vtanh.f32 %v118_v1  ;;  %v139_v1 = vmul.f32 %v518_v0, %v74_v56  ;;  %v158_v56 = vmul.f32 %v518_v0, %v93_v50 }
  0x22   :  { %v347_v15 = vpop.eup %346  ;;  %240 = vst [vmem:[#allocation6 + $0x88] sm:$0xff] %v345_v12  ;;  %358 = vtanh.f32 %v119_v4  ;;  %v140_v4 = vmul.f32 %v518_v0, %v75_v59 }
  0x23   :  { %v349_v18 = vpop.eup %348  ;;  %241 = vst [vmem:[#allocation6 + $0x90] sm:$0xff] %v347_v15  ;;  %360 = vtanh.f32 %v120_v7  ;;  %v141_v7 = vmul.f32 %v518_v0, %v76_v62 }
  0x24   :  { %v351_v21 = vpop.eup %350  ;;  %242 = vst [vmem:[#allocation6 + $0x98] sm:$0xff] %v349_v18  ;;  %362 = vtanh.f32 %v121_v10  ;;  %v142_v10 = vmul.f32 %v518_v0, %v77_v2 }
  0x25   :  { %v353_v24 = vpop.eup %352  ;;  %243 = vst [vmem:[#allocation6 + $0xa0] sm:$0xff] %v351_v21  ;;  %364 = vtanh.f32 %v122_v13  ;;  %v143_v13 = vmul.f32 %v518_v0, %v78_v5 }
  0x26   :  { %v355_v27 = vpop.eup %354  ;;  %244 = vst [vmem:[#allocation6 + $0xa8] sm:$0xff] %v353_v24  ;;  %366 = vtanh.f32 %v123_v16  ;;  %v144_v16 = vmul.f32 %v518_v0, %v79_v8 }
  0x27   :  { %v357_v30 = vpop.eup %356  ;;  %245 = vst [vmem:[#allocation6 + $0xb0] sm:$0xff] %v355_v27  ;;  %368 = vtanh.f32 %v124_v19  ;;  %v145_v19 = vmul.f32 %v518_v0, %v80_v11 }
  0x28   :  { %v359_v33 = vpop.eup %358  ;;  %246 = vst [vmem:[#allocation6 + $0xb8] sm:$0xff] %v357_v30  ;;  %370 = vtanh.f32 %v125_v22  ;;  %v146_v22 = vmul.f32 %v518_v0, %v81_v14 }
  0x29   :  { %v361_v36 = vpop.eup %360  ;;  %247 = vst [vmem:[#allocation6 + $0xc0] sm:$0xff] %v359_v33  ;;  %372 = vtanh.f32 %v126_v25  ;;  %v147_v25 = vmul.f32 %v518_v0, %v82_v17 }
  0x2a   :  { %v363_v39 = vpop.eup %362  ;;  %248 = vst [vmem:[#allocation6 + $0xc8] sm:$0xff] %v361_v36  ;;  %374 = vtanh.f32 %v127_v28  ;;  %v148_v28 = vmul.f32 %v518_v0, %v83_v20 }
  0x2b   :  { %v365_v42 = vpop.eup %364  ;;  %249 = vst [vmem:[#allocation6 + $0xd0] sm:$0xff] %v363_v39  ;;  %376 = vtanh.f32 %v128_v31  ;;  %v149_v31 = vmul.f32 %v518_v0, %v84_v23 }
  0x2c   :  { %v367_v45 = vpop.eup %366  ;;  %250 = vst [vmem:[#allocation6 + $0xd8] sm:$0xff] %v365_v42  ;;  %378 = vtanh.f32 %v129_v34  ;;  %v150_v34 = vmul.f32 %v518_v0, %v85_v26 }
  0x2d   :  { %v369_v48 = vpop.eup %368  ;;  %251 = vst [vmem:[#allocation6 + $0xe0] sm:$0xff] %v367_v45  ;;  %380 = vtanh.f32 %v130_v37  ;;  %v151_v37 = vmul.f32 %v518_v0, %v86_v29 }
  0x2e   :  { %v371_v51 = vpop.eup %370  ;;  %252 = vst [vmem:[#allocation6 + $0xe8] sm:$0xff] %v369_v48  ;;  %382 = vtanh.f32 %v131_v40  ;;  %v152_v40 = vmul.f32 %v518_v0, %v87_v32 }
  0x2f   :  { %v373_v54 = vpop.eup %372  ;;  %253 = vst [vmem:[#allocation6 + $0xf0] sm:$0xff] %v371_v51  ;;  %384 = vtanh.f32 %v132_v43  ;;  %v153_v43 = vmul.f32 %v518_v0, %v88_v35 }
  0x30   :  { %v375_v57 = vpop.eup %374  ;;  %254 = vst [vmem:[#allocation6 + $0xf8] sm:$0xff] %v373_v54  ;;  %386 = vtanh.f32 %v133_v46  ;;  %v154_v46 = vmul.f32 %v518_v0, %v89_v38  ;;  %v157_v54 = vmul.f32 %v518_v0, %v92_v47 }
  0x31   :  { %v377_v60 = vpop.eup %376  ;;  %255 = vst [vmem:[#allocation6 + $0x100] sm:$0xff] %v375_v57  ;;  %388 = vtanh.f32 %v134_v49  ;;  %v155_v49 = vmul.f32 %v518_v0, %v90_v41 }
  0x32   :  { %v379_v63 = vpop.eup %378  ;;  %256 = vst [vmem:[#allocation6 + $0x108] sm:$0xff] %v377_v60  ;;  %390 = vtanh.f32 %v135_v52  ;;  %v156_v52 = vmul.f32 %v518_v0, %v91_v44 }
  0x33   :  { %v381_v3 = vpop.eup %380  ;;  %257 = vst [vmem:[#allocation6 + $0x110] sm:$0xff] %v379_v63  ;;  %392 = vtanh.f32 %v136_v55 }
  0x34   :  { %v383_v6 = vpop.eup %382  ;;  %258 = vst [vmem:[#allocation6 + $0x118] sm:$0xff] %v381_v3  ;;  %394 = vtanh.f32 %v137_v58 }
  0x35   :  { %v385_v9 = vpop.eup %384  ;;  %259 = vst [vmem:[#allocation6 + $0x120] sm:$0xff] %v383_v6  ;;  %396 = vtanh.f32 %v138_v61 }
  0x36   :  { %v387_v12 = vpop.eup %386  ;;  %260 = vst [vmem:[#allocation6 + $0x128] sm:$0xff] %v385_v9  ;;  %398 = vtanh.f32 %v139_v1 }
  0x37   :  { %v389_v15 = vpop.eup %388  ;;  %261 = vst [vmem:[#allocation6 + $0x130] sm:$0xff] %v387_v12  ;;  %400 = vtanh.f32 %v140_v4 }
  0x38   :  { %v391_v18 = vpop.eup %390  ;;  %262 = vst [vmem:[#allocation6 + $0x138] sm:$0xff] %v389_v15  ;;  %402 = vtanh.f32 %v141_v7 }
  0x39   :  { %v393_v21 = vpop.eup %392  ;;  %263 = vst [vmem:[#allocation6 + $0x140] sm:$0xff] %v391_v18  ;;  %404 = vtanh.f32 %v142_v10 }
  0x3a   :  { %v395_v24 = vpop.eup %394  ;;  %264 = vst [vmem:[#allocation6 + $0x148] sm:$0xff] %v393_v21  ;;  %406 = vtanh.f32 %v143_v13 }
  0x3b   :  { %v397_v27 = vpop.eup %396  ;;  %265 = vst [vmem:[#allocation6 + $0x150] sm:$0xff] %v395_v24  ;;  %408 = vtanh.f32 %v144_v16 }
  0x3c   :  { %v399_v30 = vpop.eup %398  ;;  %266 = vst [vmem:[#allocation6 + $0x158] sm:$0xff] %v397_v27  ;;  %410 = vtanh.f32 %v145_v19 }
  0x3d   :  { %v401_v33 = vpop.eup %400  ;;  %267 = vst [vmem:[#allocation6 + $0x160] sm:$0xff] %v399_v30  ;;  %412 = vtanh.f32 %v146_v22 }
  0x3e   :  { %v403_v36 = vpop.eup %402  ;;  %268 = vst [vmem:[#allocation6 + $0x168] sm:$0xff] %v401_v33  ;;  %414 = vtanh.f32 %v147_v25 }
  0x3f   :  { %v405_v39 = vpop.eup %404  ;;  %269 = vst [vmem:[#allocation6 + $0x170] sm:$0xff] %v403_v36  ;;  %416 = vtanh.f32 %v148_v28 }
  0x40   :  { %v407_v42 = vpop.eup %406  ;;  %270 = vst [vmem:[#allocation6 + $0x178] sm:$0xff] %v405_v39  ;;  %418 = vtanh.f32 %v149_v31 }
  0x41   :  { %v409_v45 = vpop.eup %408  ;;  %271 = vst [vmem:[#allocation6 + $0x180] sm:$0xff] %v407_v42  ;;  %420 = vtanh.f32 %v150_v34 }
  0x42   :  { %v411_v48 = vpop.eup %410  ;;  %272 = vst [vmem:[#allocation6 + $0x188] sm:$0xff] %v409_v45  ;;  %422 = vtanh.f32 %v151_v37 }
  0x43   :  { %v413_v51 = vpop.eup %412  ;;  %273 = vst [vmem:[#allocation6 + $0x190] sm:$0xff] %v411_v48  ;;  %424 = vtanh.f32 %v152_v40 }
  0x44   :  { %v415_v53 = vpop.eup %414  ;;  %274 = vst [vmem:[#allocation6 + $0x198] sm:$0xff] %v413_v51  ;;  %426 = vtanh.f32 %v153_v43 }
  0x45   :  { %v417_v55 = vpop.eup %416  ;;  %275 = vst [vmem:[#allocation6 + $0x1a0] sm:$0xff] %v415_v53  ;;  %428 = vtanh.f32 %v154_v46 }
  0x46   :  { %v419_v57 = vpop.eup %418  ;;  %276 = vst [vmem:[#allocation6 + $0x1a8] sm:$0xff] %v417_v55  ;;  %430 = vtanh.f32 %v155_v49 }
  0x47   :  { %v421_v58 = vpop.eup %420  ;;  %277 = vst [vmem:[#allocation6 + $0x1b0] sm:$0xff] %v419_v57  ;;  %432 = vtanh.f32 %v156_v52 }
  0x48   :  { %v423_v59 = vpop.eup %422  ;;  %278 = vst [vmem:[#allocation6 + $0x1b8] sm:$0xff] %v421_v58  ;;  %434 = vtanh.f32 %v157_v54 }
  0x49   :  { %v425_v60 = vpop.eup %424  ;;  %279 = vst [vmem:[#allocation6 + $0x1c0] sm:$0xff] %v423_v59  ;;  %436 = vtanh.f32 %v158_v56 }
  0x4a   :  { %v427_v61 = vpop.eup %426  ;;  %280 = vst [vmem:[#allocation6 + $0x1c8] sm:$0xff] %v425_v60 }
  0x4b   :  { %v429_v62 = vpop.eup %428  ;;  %281 = vst [vmem:[#allocation6 + $0x1d0] sm:$0xff] %v427_v61 }
  0x4c   :  { %v431_v63 = vpop.eup %430  ;;  %282 = vst [vmem:[#allocation6 + $0x1d8] sm:$0xff] %v429_v62 }
  0x4d   :  { %v433_v1 = vpop.eup %432  ;;  %283 = vst [vmem:[#allocation6 + $0x1e0] sm:$0xff] %v431_v63 }
  0x4e   :  { %v435_v0 = vpop.eup %434  ;;  %284 = vst [vmem:[#allocation6 + $0x1e8] sm:$0xff] %v433_v1 }
  0x4f   :  { %v437_v2 = vpop.eup %436  ;;  %285 = vst [vmem:[#allocation6 + $0x1f0] sm:$0xff] %v435_v0 }
  0x50   :  { %286 = vst [vmem:[#allocation6 + $0x1f8] sm:$0xff] %v437_v2 }
  0x51   :  { %290 = vsyncadd [#allocation5], 7936  ;;  %s293_s18 = sshll.u32 %s592_s2, 4  ;;  %s493_s19 = smov [#allocation6]   ;;  %s294_s18 = int_to_ptr.hbm [resolvable:$true] %s293_s18 }
  0x52   :  { %s291_s20 = sshll.u32 %s493_s19, 4  ;;  %s292_s20 = int_to_ptr.vmem [resolvable:$true] %s291_s20 }
  0x53   :  { %299 = dma.vmem_to_hbm [thread:$0]  %s292_s20, 256, %s294_s18, [#allocation5], %s491_s14, %s491_s14, %s492_s15  }
  0x54   :  { %488 = dma.done.wait [#allocation5], 8192  }
  0x55   :  { %489 = vsyncadd [#allocation5], 4294959104 }
  0x56   :  { %304 = vsyncpa [#allocation4], 1 }
  0x57   :  { %305 = vsyncpa [#allocation5], 1 }

</bundles_post_ra>
